<compile_context>
chip_gen: v5e
topology: v5e:2x2
jax: 0.10.0
libtpu: 0.0.40
codegen_flags: <defaults>
</compile_context>

<pallas_src>
import functools

import jax
import jax.numpy as jnp
from jax import lax
from jax.experimental import pallas as pl
from jax.experimental.pallas import tpu as pltpu

EPS = 1e-5


# --------------------------------------------------------------------------------------
# Host-side weight / constant preprocessing.
# --------------------------------------------------------------------------------------
def _banded_conv_weights(w_hwio, W):
    """(3, 3, Cin, Cout) HWIO conv weights -> (3*W*Cin, W*Cout) banded matrix B with

        B[kh*W*Cin + wi*Cin + ci, wo*Cout + co] = w[kh, wi - wo + 1, ci, co]  (0 if invalid)

    so conv(x)[row h] = [x[h-1] | x[h] | x[h+1]] @ B  (SAME padding in W encoded by the
    structural zeros; H padding handled by the kernel via masked row shifts)."""
    KH, KW, Cin, Cout = w_hwio.shape
    wi = jnp.arange(W)[:, None]          # input pixel column
    wo = jnp.arange(W)[None, :]          # output pixel column
    off = wi - wo + 1                    # kw tap index
    valid = (off >= 0) & (off < KW)
    offc = jnp.clip(off, 0, KW - 1)
    b = w_hwio[:, offc, :, :]                                      # (KH, Wi, Wo, Cin, Cout)
    b = jnp.where(valid[None, :, :, None, None], b, 0.0)
    b = b.transpose(0, 1, 3, 2, 4).reshape(KH, W * Cin, W * Cout)  # (KH, Wi*Cin, Wo*Cout)
    return b.reshape(KH * W * Cin, W * Cout).astype(jnp.float32)   # stacked along K


def _channel_maps(W, C):
    """P (W*C, C): one-hot lane->channel selector (per-channel lane reduce via matmul);
       Pt = P^T broadcasts a per-channel (1, C) vector back to the (1, W*C) lane layout."""
    lane_c = jnp.tile(jnp.arange(C), W)                            # channel of each lane
    p = (lane_c[:, None] == jnp.arange(C)[None, :]).astype(jnp.float32)
    return p, p.T


# --------------------------------------------------------------------------------------
# In-kernel helpers (lane-dense (rows, W*C) values held in registers).
# --------------------------------------------------------------------------------------
def _shift_rows(x, mask_up, mask_dn):
    """x_up[r] = x[r-1] (0 at each image's first row), x_dn[r] = x[r+1] (0 at last row).
    Correct because every image occupies a contiguous block of H rows and the (rows, 1)
    masks are precomputed on the host from r % H."""
    rows, WC = x.shape
    zrow = jnp.zeros((1, WC), x.dtype)
    x_up = jnp.concatenate([zrow, x[:rows - 1, :]], axis=0) * mask_up
    x_dn = jnp.concatenate([x[1:, :], zrow], axis=0) * mask_dn
    return x_up, x_dn


def _conv3x3_banded(x, b, mask_up, mask_dn):
    """3x3 SAME conv as ONE MXU matmul with K = 3*W*Cin (lane-concat is 128-aligned)."""
    x_up, x_dn = _shift_rows(x, mask_up, mask_dn)
    xcat = jnp.concatenate([x_up, x, x_dn], axis=1)                # (rows, 3*WC)
    return jnp.dot(xcat, b, preferred_element_type=jnp.float32)    # (rows, WC)


def _bn_train_scale_shift(acc, p, pt, gamma, beta, inv_count):
    """Training-mode BN over (N, H, W): finalize per-lane scale/shift entirely in-kernel."""
    s = jnp.sum(acc, axis=0, keepdims=True)                        # (1, WC) row reduce
    ss = jnp.sum(acc * acc, axis=0, keepdims=True)                 # (1, WC)
    ch = jnp.dot(jnp.concatenate([s, ss], axis=0), p,
                 preferred_element_type=jnp.float32)               # (2, C) lane reduce
    mean = ch[0:1, :] * inv_count
    var = ch[1:2, :] * inv_count - mean * mean                     # biased (train-mode) var
    scale_c = gamma * lax.rsqrt(var + EPS)                         # rsqrt -> EUP slot
    shift_c = beta - mean * scale_c
    both = jnp.dot(jnp.concatenate([scale_c, shift_c], axis=0), pt,
                   preferred_element_type=jnp.float32)             # (2, WC) lane broadcast
    return both[0:1, :], both[1:2, :]


# --------------------------------------------------------------------------------------
# Fused kernel: conv1 -> bn1 -> relu -> conv2 -> bn2 -> +x -> relu, single grid step.
# --------------------------------------------------------------------------------------
def _fused_residual_kernel(inv_count,
                           x_ref, b1_ref, b2_ref, p_ref, pt_ref,
                           g1_ref, be1_ref, g2_ref, be2_ref,
                           mup_ref, mdn_ref, o_ref):
    x = x_ref[...]
    mup = mup_ref[...]
    mdn = mdn_ref[...]
    p = p_ref[...]
    pt = pt_ref[...]

    s1 = _conv3x3_banded(x, b1_ref[...], mup, mdn)                 # conv1 (bias folded out)
    sc1, sh1 = _bn_train_scale_shift(s1, p, pt, g1_ref[...], be1_ref[...], inv_count)
    y = jnp.maximum(s1 * sc1 + sh1, 0.0)                           # bn1 + relu

    s2 = _conv3x3_banded(y, b2_ref[...], mup, mdn)                 # conv2
    sc2, sh2 = _bn_train_scale_shift(s2, p, pt, g2_ref[...], be2_ref[...], inv_count)
    o_ref[...] = jnp.maximum(s2 * sc2 + sh2 + x, 0.0)              # bn2 + skip + relu


# --------------------------------------------------------------------------------------
# Host-side wrapper.
# --------------------------------------------------------------------------------------
def residual_forward(x_nhwc, params):
    """Residual block forward (identity skip).  x_nhwc: (N, H, W, C) float32, NHWC."""
    w1, b1, g1, be1, w2, b2, g2, be2 = params
    del b1, b2   # conv biases are exactly cancelled by training-mode BN mean subtraction

    N, H, W, C = x_nhwc.shape
    Cout = w1.shape[-1]
    assert C == Cout and w2.shape[-1] == Cout, "identity skip requires Cin == Cout"
    WC = W * C
    assert WC % 128 == 0, "lane-dense layout requires W*C to be a multiple of 128"
    rows = N * H
    assert rows % 8 == 0, "N*H must be a multiple of 8 sublanes"
    inv_count = 1.0 / float(N * H * W)

    x2 = x_nhwc.reshape(rows, WC).astype(jnp.float32)              # free reshape (contiguous)
    B1 = _banded_conv_weights(w1.astype(jnp.float32), W)           # (3*WC, WC)
    B2 = _banded_conv_weights(w2.astype(jnp.float32), W)
    P, Pt = _channel_maps(W, C)                                    # (WC, C), (C, WC)

    r = jnp.arange(rows)
    mask_up = (r % H != 0).astype(jnp.float32).reshape(rows, 1)    # 0 at first row of image
    mask_dn = (r % H != H - 1).astype(jnp.float32).reshape(rows, 1)  # 0 at last row of image

    # Generation-aware VMEM budgeting (v7x has 64 MiB/TC vs. 128 MiB on v5e/v6e).
    try:
        cap = int(pltpu.get_tpu_info().vmem_capacity_bytes)
    except Exception:
        cap = 64 << 20
    resident = 4 * (8 * rows * WC + 2 * 3 * WC * WC + 2 * WC * C + 4 * C + 2 * rows)
    if resident > int(0.4 * cap):
        # TODO(synk): (phase, tile)-grid variant with VMEM-scratch stat accumulators
        #             finalized under pl.when for batches that overflow VMEM.
        raise NotImplementedError("batch too large for the fused single-call path")
    vlim = int(min(max(2 * resident + (4 << 20), 16 << 20), int(0.45 * cap)))

    flops = 2 * 2 * rows * (3 * WC) * WC + 16 * rows * WC
    bytes_acc = 4 * (2 * rows * WC + 2 * 3 * WC * WC + 2 * WC * C + 4 * C + 2 * rows)

    in_specs = [
        pl.BlockSpec((rows, WC), lambda i: (0, 0)),        # x
        pl.BlockSpec((3 * WC, WC), lambda i: (0, 0)),      # B1 (banded, K-stacked)
        pl.BlockSpec((3 * WC, WC), lambda i: (0, 0)),      # B2
        pl.BlockSpec((WC, C), lambda i: (0, 0)),           # P  (lane -> channel reduce)
        pl.BlockSpec((C, WC), lambda i: (0, 0)),           # Pt (channel -> lane broadcast)
        pl.BlockSpec((1, C), lambda i: (0, 0)),            # gamma1
        pl.BlockSpec((1, C), lambda i: (0, 0)),            # beta1
        pl.BlockSpec((1, C), lambda i: (0, 0)),            # gamma2
        pl.BlockSpec((1, C), lambda i: (0, 0)),            # beta2
        pl.BlockSpec((rows, 1), lambda i: (0, 0)),         # H-halo mask (up)
        pl.BlockSpec((rows, 1), lambda i: (0, 0)),         # H-halo mask (down)
    ]

    out2 = pl.pallas_call(
        functools.partial(_fused_residual_kernel, inv_count),
        grid=(1,),
        in_specs=in_specs,
        out_specs=pl.BlockSpec((rows, WC), lambda i: (0, 0)),
        out_shape=jax.ShapeDtypeStruct((rows, WC), jnp.float32),
        compiler_params=pltpu.CompilerParams(
            dimension_semantics=("arbitrary",), vmem_limit_bytes=vlim),
        cost_estimate=pl.CostEstimate(flops=flops, transcendentals=2 * C,
                                      bytes_accessed=bytes_acc),
    )(x2, B1, B2, P, Pt,
      g1.reshape(1, C).astype(jnp.float32), be1.reshape(1, C).astype(jnp.float32),
      g2.reshape(1, C).astype(jnp.float32), be2.reshape(1, C).astype(jnp.float32),
      mask_up, mask_dn)

    return out2.reshape(N, H, W, C)


# --------------------------------------------------------------------------------------
# Pure-JAX reference (NHWC), including the conv biases that the kernel folds away.
# --------------------------------------------------------------------------------------
def residual_ref(x, params):
    w1, b1, g1, be1, w2, b2, g2, be2 = params

    def conv3x3(inp, w, b):
        return lax.conv_general_dilated(
            inp, w, window_strides=(1, 1), padding="SAME",
            dimension_numbers=("NHWC", "HWIO", "NHWC")) + b

    def bn(y, g, be):
        m = jnp.mean(y, axis=(0, 1, 2), keepdims=True)
        v = jnp.mean((y - m) ** 2, axis=(0, 1, 2), keepdims=True)
        return (y - m) * lax.rsqrt(v + EPS) * g + be

    y = jax.nn.relu(bn(conv3x3(x, w1, b1), g1, be1))
    y = bn(conv3x3(y, w2, b2), g2, be2)
    return jax.nn.relu(y + x)


if __name__ == "__main__":
    N, H, W = 2, 16, 16
    Cin = Cout = 8   # default Residual: use_1x1conv=False, stride=1 -> Cin == Cout

    key = jax.random.PRNGKey(0)
    kx, kw1, kb1, kw2, kb2 = jax.random.split(key, 5)

    x = jax.random.normal(kx, (N, H, W, Cin), jnp.float32)              # NHWC input
    w1 = jax.random.normal(kw1, (3, 3, Cin, Cout), jnp.float32) * 0.1   # conv1.weight (HWIO)
    b1 = jax.random.normal(kb1, (Cout,), jnp.float32) * 0.1             # conv1.bias
    w2 = jax.random.normal(kw2, (3, 3, Cout, Cout), jnp.float32) * 0.1  # conv2.weight (HWIO)
    b2 = jax.random.normal(kb2, (Cout,), jnp.float32) * 0.1             # conv2.bias
    g1 = jnp.ones((Cout,), jnp.float32)    # bn1.weight
    be1 = jnp.zeros((Cout,), jnp.float32)  # bn1.bias
    g2 = jnp.ones((Cout,), jnp.float32)    # bn2.weight
    be2 = jnp.zeros((Cout,), jnp.float32)  # bn2.bias
    params = (w1, b1, g1, be1, w2, b2, g2, be2)

    fwd = jax.jit(residual_forward)
    out = jax.block_until_ready(fwd(x, params))
    ref = residual_ref(x, params)

    assert out.shape == (N, H, W, Cout)
    err = float(jnp.max(jnp.abs(out - ref)))
    assert jnp.allclose(out, ref, rtol=1e-3, atol=1e-3), f"max abs err {err}"
    print("KERNEL_OK")
</pallas_src>

<mosaic_0001>
module attributes {stable_mosaic.version = 11 : i64} {
  func.func @_fused_residual_kernel(%arg0: i32, %arg1: memref<32x128xf32, #tpu.memory_space<vmem>>, %arg2: memref<384x128xf32, #tpu.memory_space<vmem>>, %arg3: memref<384x128xf32, #tpu.memory_space<vmem>>, %arg4: memref<128x8xf32, #tpu.memory_space<vmem>>, %arg5: memref<8x128xf32, #tpu.memory_space<vmem>>, %arg6: memref<1x8xf32, #tpu.memory_space<vmem>>, %arg7: memref<1x8xf32, #tpu.memory_space<vmem>>, %arg8: memref<1x8xf32, #tpu.memory_space<vmem>>, %arg9: memref<1x8xf32, #tpu.memory_space<vmem>>, %arg10: memref<32x1xf32, #tpu.memory_space<vmem>>, %arg11: memref<32x1xf32, #tpu.memory_space<vmem>>, %arg12: memref<32x128xf32, #tpu.memory_space<vmem>>) attributes {dimension_semantics = [#tpu.dimension_semantics<arbitrary>], iteration_bounds = array<i64: 1>, scalar_prefetch = 0 : i64, scratch_operands = 0 : i64, tpu.core_type = #tpu.core_type<tc>, window_params = [{pipeline_mode = #tpu.pipeline_mode<synchronous>, transform_indices = @transform_0, window_bounds = array<i64: 32, 128>}, {pipeline_mode = #tpu.pipeline_mode<synchronous>, transform_indices = @transform_1, window_bounds = array<i64: 384, 128>}, {pipeline_mode = #tpu.pipeline_mode<synchronous>, transform_indices = @transform_2, window_bounds = array<i64: 384, 128>}, {pipeline_mode = #tpu.pipeline_mode<synchronous>, transform_indices = @transform_3, window_bounds = array<i64: 128, 8>}, {pipeline_mode = #tpu.pipeline_mode<synchronous>, transform_indices = @transform_4, window_bounds = array<i64: 8, 128>}, {pipeline_mode = #tpu.pipeline_mode<synchronous>, transform_indices = @transform_5, window_bounds = array<i64: 1, 8>}, {pipeline_mode = #tpu.pipeline_mode<synchronous>, transform_indices = @transform_6, window_bounds = array<i64: 1, 8>}, {pipeline_mode = #tpu.pipeline_mode<synchronous>, transform_indices = @transform_7, window_bounds = array<i64: 1, 8>}, {pipeline_mode = #tpu.pipeline_mode<synchronous>, transform_indices = @transform_8, window_bounds = array<i64: 1, 8>}, {pipeline_mode = #tpu.pipeline_mode<synchronous>, transform_indices = @transform_9, window_bounds = array<i64: 32, 1>}, {pipeline_mode = #tpu.pipeline_mode<synchronous>, transform_indices = @transform_10, window_bounds = array<i64: 32, 1>}, {pipeline_mode = #tpu.pipeline_mode<synchronous>, transform_indices = @transform_11, window_bounds = array<i64: 32, 128>}]} {
    %c0 = arith.constant 0 : index
    %c0_0 = arith.constant 0 : index
    %0 = vector.load %arg1[%c0, %c0_0] : memref<32x128xf32, #tpu.memory_space<vmem>>, vector<32x128xf32>
    %c0_1 = arith.constant 0 : index
    %c0_2 = arith.constant 0 : index
    %1 = vector.load %arg10[%c0_1, %c0_2] : memref<32x1xf32, #tpu.memory_space<vmem>>, vector<32x1xf32>
    %c0_3 = arith.constant 0 : index
    %c0_4 = arith.constant 0 : index
    %2 = vector.load %arg11[%c0_3, %c0_4] : memref<32x1xf32, #tpu.memory_space<vmem>>, vector<32x1xf32>
    %c0_5 = arith.constant 0 : index
    %c0_6 = arith.constant 0 : index
    %3 = vector.load %arg4[%c0_5, %c0_6] : memref<128x8xf32, #tpu.memory_space<vmem>>, vector<128x8xf32>
    %c0_7 = arith.constant 0 : index
    %c0_8 = arith.constant 0 : index
    %4 = vector.load %arg5[%c0_7, %c0_8] : memref<8x128xf32, #tpu.memory_space<vmem>>, vector<8x128xf32>
    %c0_9 = arith.constant 0 : index
    %c0_10 = arith.constant 0 : index
    %5 = vector.load %arg2[%c0_9, %c0_10] : memref<384x128xf32, #tpu.memory_space<vmem>>, vector<384x128xf32>
    %cst = arith.constant 0.000000e+00 : f32
    %6 = vector.broadcast %cst : f32 to vector<1x128xf32>
    %7 = vector.extract_strided_slice %0 {offsets = [0, 0], sizes = [31, 128], strides = [1, 1]} : vector<32x128xf32> to vector<31x128xf32>
    %8 = tpu.concatenate %6, %7 in 0 : vector<1x128xf32>, vector<31x128xf32> -> vector<32x128xf32>
    %9 = vector.broadcast %1 : vector<32x1xf32> to vector<32x128xf32>
    %10 = arith.mulf %8, %9 : vector<32x128xf32>
    %11 = vector.extract_strided_slice %0 {offsets = [1, 0], sizes = [31, 128], strides = [1, 1]} : vector<32x128xf32> to vector<31x128xf32>
    %12 = tpu.concatenate %11, %6 in 0 : vector<31x128xf32>, vector<1x128xf32> -> vector<32x128xf32>
    %13 = vector.broadcast %2 : vector<32x1xf32> to vector<32x128xf32>
    %14 = arith.mulf %12, %13 : vector<32x128xf32>
    %15 = tpu.concatenate %10, %0, %14 in 1 : vector<32x128xf32>, vector<32x128xf32>, vector<32x128xf32> -> vector<32x384xf32>
    %cst_11 = arith.constant dense<0.000000e+00> : vector<32x128xf32>
    %16 = tpu.matmul %15, %5, %cst_11 {dimension_numbers = #tpu.dot_dimension_numbers<[1], [0], [0], [1], [0, 0, 1, 1], [], []>} : vector<32x384xf32>, vector<384x128xf32>, vector<32x128xf32> -> vector<32x128xf32>
    %c0_12 = arith.constant 0 : index
    %c0_13 = arith.constant 0 : index
    %17 = vector.load %arg6[%c0_12, %c0_13] : memref<1x8xf32, #tpu.memory_space<vmem>>, vector<1x8xf32>
    %c0_14 = arith.constant 0 : index
    %c0_15 = arith.constant 0 : index
    %18 = vector.load %arg7[%c0_14, %c0_15] : memref<1x8xf32, #tpu.memory_space<vmem>>, vector<1x8xf32>
    %cst_16 = arith.constant dense<0.000000e+00> : vector<128xf32>
    %19 = vector.multi_reduction <add>, %16, %cst_16 [0] : vector<32x128xf32> to vector<128xf32>
    %20 = vector.shape_cast %19 : vector<128xf32> to vector<1x128xf32>
    %21 = arith.mulf %16, %16 : vector<32x128xf32>
    %cst_17 = arith.constant dense<0.000000e+00> : vector<128xf32>
    %22 = vector.multi_reduction <add>, %21, %cst_17 [0] : vector<32x128xf32> to vector<128xf32>
    %23 = vector.shape_cast %22 : vector<128xf32> to vector<1x128xf32>
    %24 = tpu.concatenate %20, %23 in 0 : vector<1x128xf32>, vector<1x128xf32> -> vector<2x128xf32>
    %cst_18 = arith.constant dense<0.000000e+00> : vector<2x8xf32>
    %25 = tpu.matmul %24, %3, %cst_18 {dimension_numbers = #tpu.dot_dimension_numbers<[1], [0], [0], [1], [0, 0, 1, 1], [], []>} : vector<2x128xf32>, vector<128x8xf32>, vector<2x8xf32> -> vector<2x8xf32>
    %26 = vector.extract_strided_slice %25 {offsets = [0, 0], sizes = [1, 8], strides = [1, 1]} : vector<2x8xf32> to vector<1x8xf32>
    %cst_19 = arith.constant 0.001953125 : f32
    %27 = vector.broadcast %cst_19 : f32 to vector<1x8xf32>
    %28 = arith.mulf %26, %27 : vector<1x8xf32>
    %29 = vector.extract_strided_slice %25 {offsets = [1, 0], sizes = [1, 8], strides = [1, 1]} : vector<2x8xf32> to vector<1x8xf32>
    %cst_20 = arith.constant 0.001953125 : f32
    %30 = vector.broadcast %cst_20 : f32 to vector<1x8xf32>
    %31 = arith.mulf %29, %30 : vector<1x8xf32>
    %32 = arith.mulf %28, %28 : vector<1x8xf32>
    %33 = arith.subf %31, %32 : vector<1x8xf32>
    %cst_21 = arith.constant 9.99999974E-6 : f32
    %34 = vector.broadcast %cst_21 : f32 to vector<1x8xf32>
    %35 = arith.addf %33, %34 : vector<1x8xf32>
    %36 = math.rsqrt %35 : vector<1x8xf32>
    %37 = arith.mulf %17, %36 : vector<1x8xf32>
    %38 = arith.mulf %28, %37 : vector<1x8xf32>
    %39 = arith.subf %18, %38 : vector<1x8xf32>
    %40 = tpu.concatenate %37, %39 in 0 : vector<1x8xf32>, vector<1x8xf32> -> vector<2x8xf32>
    %cst_22 = arith.constant dense<0.000000e+00> : vector<2x128xf32>
    %41 = tpu.matmul %40, %4, %cst_22 {dimension_numbers = #tpu.dot_dimension_numbers<[1], [0], [0], [1], [0, 0, 1, 1], [], []>} : vector<2x8xf32>, vector<8x128xf32>, vector<2x128xf32> -> vector<2x128xf32>
    %42 = vector.extract_strided_slice %41 {offsets = [0, 0], sizes = [1, 128], strides = [1, 1]} : vector<2x128xf32> to vector<1x128xf32>
    %43 = vector.extract_strided_slice %41 {offsets = [1, 0], sizes = [1, 128], strides = [1, 1]} : vector<2x128xf32> to vector<1x128xf32>
    %44 = vector.broadcast %42 : vector<1x128xf32> to vector<32x128xf32>
    %45 = arith.mulf %16, %44 : vector<32x128xf32>
    %46 = vector.broadcast %43 : vector<1x128xf32> to vector<32x128xf32>
    %47 = arith.addf %45, %46 : vector<32x128xf32>
    %cst_23 = arith.constant 0.000000e+00 : f32
    %48 = vector.broadcast %cst_23 : f32 to vector<32x128xf32>
    %49 = arith.maximumf %47, %48 : vector<32x128xf32>
    %c0_24 = arith.constant 0 : index
    %c0_25 = arith.constant 0 : index
    %50 = vector.load %arg3[%c0_24, %c0_25] : memref<384x128xf32, #tpu.memory_space<vmem>>, vector<384x128xf32>
    %cst_26 = arith.constant 0.000000e+00 : f32
    %51 = vector.broadcast %cst_26 : f32 to vector<1x128xf32>
    %52 = vector.extract_strided_slice %49 {offsets = [0, 0], sizes = [31, 128], strides = [1, 1]} : vector<32x128xf32> to vector<31x128xf32>
    %53 = tpu.concatenate %51, %52 in 0 : vector<1x128xf32>, vector<31x128xf32> -> vector<32x128xf32>
    %54 = vector.broadcast %1 : vector<32x1xf32> to vector<32x128xf32>
    %55 = arith.mulf %53, %54 : vector<32x128xf32>
    %56 = vector.extract_strided_slice %49 {offsets = [1, 0], sizes = [31, 128], strides = [1, 1]} : vector<32x128xf32> to vector<31x128xf32>
    %57 = tpu.concatenate %56, %51 in 0 : vector<31x128xf32>, vector<1x128xf32> -> vector<32x128xf32>
    %58 = vector.broadcast %2 : vector<32x1xf32> to vector<32x128xf32>
    %59 = arith.mulf %57, %58 : vector<32x128xf32>
    %60 = tpu.concatenate %55, %49, %59 in 1 : vector<32x128xf32>, vector<32x128xf32>, vector<32x128xf32> -> vector<32x384xf32>
    %cst_27 = arith.constant dense<0.000000e+00> : vector<32x128xf32>
    %61 = tpu.matmul %60, %50, %cst_27 {dimension_numbers = #tpu.dot_dimension_numbers<[1], [0], [0], [1], [0, 0, 1, 1], [], []>} : vector<32x384xf32>, vector<384x128xf32>, vector<32x128xf32> -> vector<32x128xf32>
    %c0_28 = arith.constant 0 : index
    %c0_29 = arith.constant 0 : index
    %62 = vector.load %arg8[%c0_28, %c0_29] : memref<1x8xf32, #tpu.memory_space<vmem>>, vector<1x8xf32>
    %c0_30 = arith.constant 0 : index
    %c0_31 = arith.constant 0 : index
    %63 = vector.load %arg9[%c0_30, %c0_31] : memref<1x8xf32, #tpu.memory_space<vmem>>, vector<1x8xf32>
    %cst_32 = arith.constant dense<0.000000e+00> : vector<128xf32>
    %64 = vector.multi_reduction <add>, %61, %cst_32 [0] : vector<32x128xf32> to vector<128xf32>
    %65 = vector.shape_cast %64 : vector<128xf32> to vector<1x128xf32>
    %66 = arith.mulf %61, %61 : vector<32x128xf32>
    %cst_33 = arith.constant dense<0.000000e+00> : vector<128xf32>
    %67 = vector.multi_reduction <add>, %66, %cst_33 [0] : vector<32x128xf32> to vector<128xf32>
    %68 = vector.shape_cast %67 : vector<128xf32> to vector<1x128xf32>
    %69 = tpu.concatenate %65, %68 in 0 : vector<1x128xf32>, vector<1x128xf32> -> vector<2x128xf32>
    %cst_34 = arith.constant dense<0.000000e+00> : vector<2x8xf32>
    %70 = tpu.matmul %69, %3, %cst_34 {dimension_numbers = #tpu.dot_dimension_numbers<[1], [0], [0], [1], [0, 0, 1, 1], [], []>} : vector<2x128xf32>, vector<128x8xf32>, vector<2x8xf32> -> vector<2x8xf32>
    %71 = vector.extract_strided_slice %70 {offsets = [0, 0], sizes = [1, 8], strides = [1, 1]} : vector<2x8xf32> to vector<1x8xf32>
    %cst_35 = arith.constant 0.001953125 : f32
    %72 = vector.broadcast %cst_35 : f32 to vector<1x8xf32>
    %73 = arith.mulf %71, %72 : vector<1x8xf32>
    %74 = vector.extract_strided_slice %70 {offsets = [1, 0], sizes = [1, 8], strides = [1, 1]} : vector<2x8xf32> to vector<1x8xf32>
    %cst_36 = arith.constant 0.001953125 : f32
    %75 = vector.broadcast %cst_36 : f32 to vector<1x8xf32>
    %76 = arith.mulf %74, %75 : vector<1x8xf32>
    %77 = arith.mulf %73, %73 : vector<1x8xf32>
    %78 = arith.subf %76, %77 : vector<1x8xf32>
    %cst_37 = arith.constant 9.99999974E-6 : f32
    %79 = vector.broadcast %cst_37 : f32 to vector<1x8xf32>
    %80 = arith.addf %78, %79 : vector<1x8xf32>
    %81 = math.rsqrt %80 : vector<1x8xf32>
    %82 = arith.mulf %62, %81 : vector<1x8xf32>
    %83 = arith.mulf %73, %82 : vector<1x8xf32>
    %84 = arith.subf %63, %83 : vector<1x8xf32>
    %85 = tpu.concatenate %82, %84 in 0 : vector<1x8xf32>, vector<1x8xf32> -> vector<2x8xf32>
    %cst_38 = arith.constant dense<0.000000e+00> : vector<2x128xf32>
    %86 = tpu.matmul %85, %4, %cst_38 {dimension_numbers = #tpu.dot_dimension_numbers<[1], [0], [0], [1], [0, 0, 1, 1], [], []>} : vector<2x8xf32>, vector<8x128xf32>, vector<2x128xf32> -> vector<2x128xf32>
    %87 = vector.extract_strided_slice %86 {offsets = [0, 0], sizes = [1, 128], strides = [1, 1]} : vector<2x128xf32> to vector<1x128xf32>
    %88 = vector.extract_strided_slice %86 {offsets = [1, 0], sizes = [1, 128], strides = [1, 1]} : vector<2x128xf32> to vector<1x128xf32>
    %89 = vector.broadcast %87 : vector<1x128xf32> to vector<32x128xf32>
    %90 = arith.mulf %61, %89 : vector<32x128xf32>
    %91 = vector.broadcast %88 : vector<1x128xf32> to vector<32x128xf32>
    %92 = arith.addf %90, %91 : vector<32x128xf32>
    %93 = arith.addf %92, %0 : vector<32x128xf32>
    %cst_39 = arith.constant 0.000000e+00 : f32
    %94 = vector.broadcast %cst_39 : f32 to vector<32x128xf32>
    %95 = arith.maximumf %93, %94 : vector<32x128xf32>
    %c0_40 = arith.constant 0 : index
    %c0_41 = arith.constant 0 : index
    %96 = vector.load %arg12[%c0_40, %c0_41] : memref<32x128xf32, #tpu.memory_space<vmem>>, vector<32x128xf32>
    tpu.vector_store %arg12[%c0_40, %c0_41], %95 {strides = array<i32>} : memref<32x128xf32, #tpu.memory_space<vmem>>, vector<32x128xf32>,
    return
  }
  func.func @transform_0(%arg0: i32) -> (i32, i32) {
    %c0_i32 = arith.constant 0 : i32
    %c0_i32_0 = arith.constant 0 : i32
    %c0_i32_1 = arith.constant 0 : i32
    return %c0_i32, %c0_i32_0 : i32, i32
  }
  func.func @transform_1(%arg0: i32) -> (i32, i32) {
    %c0_i32 = arith.constant 0 : i32
    %c0_i32_0 = arith.constant 0 : i32
    %c0_i32_1 = arith.constant 0 : i32
    return %c0_i32, %c0_i32_0 : i32, i32
  }
  func.func @transform_2(%arg0: i32) -> (i32, i32) {
    %c0_i32 = arith.constant 0 : i32
    %c0_i32_0 = arith.constant 0 : i32
    %c0_i32_1 = arith.constant 0 : i32
    return %c0_i32, %c0_i32_0 : i32, i32
  }
  func.func @transform_3(%arg0: i32) -> (i32, i32) {
    %c0_i32 = arith.constant 0 : i32
    %c0_i32_0 = arith.constant 0 : i32
    %c0_i32_1 = arith.constant 0 : i32
    return %c0_i32, %c0_i32_0 : i32, i32
  }
  func.func @transform_4(%arg0: i32) -> (i32, i32) {
    %c0_i32 = arith.constant 0 : i32
    %c0_i32_0 = arith.constant 0 : i32
    %c0_i32_1 = arith.constant 0 : i32
    return %c0_i32, %c0_i32_0 : i32, i32
  }
  func.func @transform_5(%arg0: i32) -> (i32, i32) {
    %c0_i32 = arith.constant 0 : i32
    %c0_i32_0 = arith.constant 0 : i32
    %c0_i32_1 = arith.constant 0 : i32
    return %c0_i32, %c0_i32_0 : i32, i32
  }
  func.func @transform_6(%arg0: i32) -> (i32, i32) {
    %c0_i32 = arith.constant 0 : i32
    %c0_i32_0 = arith.constant 0 : i32
    %c0_i32_1 = arith.constant 0 : i32
    return %c0_i32, %c0_i32_0 : i32, i32
  }
  func.func @transform_7(%arg0: i32) -> (i32, i32) {
    %c0_i32 = arith.constant 0 : i32
    %c0_i32_0 = arith.constant 0 : i32
    %c0_i32_1 = arith.constant 0 : i32
    return %c0_i32, %c0_i32_0 : i32, i32
  }
  func.func @transform_8(%arg0: i32) -> (i32, i32) {
    %c0_i32 = arith.constant 0 : i32
    %c0_i32_0 = arith.constant 0 : i32
    %c0_i32_1 = arith.constant 0 : i32
    return %c0_i32, %c0_i32_0 : i32, i32
  }
  func.func @transform_9(%arg0: i32) -> (i32, i32) {
    %c0_i32 = arith.constant 0 : i32
    %c0_i32_0 = arith.constant 0 : i32
    %c0_i32_1 = arith.constant 0 : i32
    return %c0_i32, %c0_i32_0 : i32, i32
  }
  func.func @transform_10(%arg0: i32) -> (i32, i32) {
    %c0_i32 = arith.constant 0 : i32
    %c0_i32_0 = arith.constant 0 : i32
    %c0_i32_1 = arith.constant 0 : i32
    return %c0_i32, %c0_i32_0 : i32, i32
  }
  func.func @transform_11(%arg0: i32) -> (i32, i32) {
    %c0_i32 = arith.constant 0 : i32
    %c0_i32_0 = arith.constant 0 : i32
    %c0_i32_1 = arith.constant 0 : i32
    return %c0_i32, %c0_i32_0 : i32, i32
  }
}

</mosaic_0001>

<bundles_post_ra>
// kernel: eq.10
= control target key start
LH: loop header
LB: loop body
LE: loop exit
PB: predicated region body
PF: predicated region fallthrough
CT: control target
= control target key end

     0   :  { %s131_s10 = smov 120   ;;  %s132_s11 = smov 104   ;;  %vm3_vm0 = vcmask 64512   ;;  %vm9_vm1 = vcmask 1048512   ;;  %vm15_vm2 = vcmask 982912   ;;  %vm21_vm3 = vcmask 917312   ;;  %s207_s0 = inlined_call_operand.vmem [shape: s32[16,8], index: 0, kind: input, shape index: {}]   ;;  %s208_s1 = inlined_call_operand.vmem [shape: s32[128], index: 1, kind: output, shape index: {}]  }
   0x1   :  { %v101_v0 = vld [vmem:[%s207_s0 + $0xf] sm:$0x1]   ;;  %v103_v1 = vld [vmem:[%s207_s0 + $0xd] sm:$0x1]   ;;  %v105_v2 = vld [vmem:[%s207_s0 + $0xb] sm:$0x1]  }
   0x2   :  { %7 = vrot.lane.b32.xlu0 %v101_v0, %s131_s10  ;;  %19 = vrot.lane.b32.xlu1 %v103_v1, %s132_s11  ;;  %s133_s14 = smov 88   ;;  %v102_v3 = vld [vmem:[%s207_s0 + $0xe] sm:$0x1]   ;;  %v104_v4 = vld [vmem:[%s207_s0 + $0xc] sm:$0x1]   ;;  %s134_s19 = smov 112  }
   0x3   :  { %31 = vrot.lane.b32.xlu2 %v105_v2, %s133_s14  ;;  %s135_s20 = smov 96   ;;  %v106_v5 = vld [vmem:[%s207_s0 + $0xa] sm:$0x1]   ;;  %s136_s23 = smov 80   ;;  %v107_v6 = vld [vmem:[%s207_s0 + $0x9] sm:$0x1]  }
   0x4   :  { %v108_v7 = vld [vmem:[%s207_s0 + $0x8] sm:$0x1]   ;;  %s137_s28 = smov 72   ;;  %s138_s29 = smov 64   ;;  %v109_v8 = vld [vmem:[%s207_s0 + $0x7] sm:$0x1]  }
   0x5   :  { %s139_s3 = smov 56   ;;  %v110_v9 = vld [vmem:[%s207_s0 + $0x6] sm:$0x1]   ;;  %v111_v10 = vld [vmem:[%s207_s0 + $0x5] sm:$0x1]   ;;  %s140_s8 = smov 48  }
   0x6   :  { %s141_s9 = smov 40   ;;  %v112_v11 = vld [vmem:[%s207_s0 + $0x4] sm:$0x1]   ;;  %s142_s12 = smov 32   ;;  %v113_v12 = vld [vmem:[%s207_s0 + $0x3] sm:$0x1]  }
   0x7   :  { %v114_v13 = vld [vmem:[%s207_s0 + $0x2] sm:$0x1]   ;;  %s143_s17 = smov 24   ;;  %s144_s18 = smov 16   ;;  %v115_v14 = vld [vmem:[%s207_s0 + $0x1] sm:$0x1]  }
   0x8   :  { %s145_s21 = smov 8   ;;  %v2_v15 = vld [vmem:[%s207_s0] sm:$0x1]   ;;  %vm27_vm4 = vcmask 851712   ;;  %vm33_vm5 = vcmask 786112   ;;  %vm39_vm6 = vcmask 720512  }
   0x9   :  { %4 = vst.msk [vmem:[#allocation0] sm:$0x1] %vm3_vm0, %v2_v15   ;;  %vm45_vm7 = vcmask 654912   ;;  %vm51_vm8 = vcmask 589312   ;;  %vm57_vm9 = vcmask 523712   ;;  %vm63_vm10 = vcmask 458112  }
   0xa   :  { %13 = vrot.lane.b32.xlu0 %v102_v3, %s134_s19  ;;  %25 = vrot.lane.b32.xlu1 %v104_v4, %s135_s20  ;;  %vm69_vm11 = vcmask 392512   ;;  %vm75_vm12 = vcmask 326912   ;;  %vm81_vm13 = vcmask 261312   ;;  %vm87_vm14 = vcmask 195712  }
   0xb   :  { %37 = vrot.lane.b32.xlu2 %v106_v5, %s136_s23  ;;  %vm93_vm15 = vcmask 130112  }
  0x12   :  { %43 = vrot.lane.b32.xlu0 %v107_v6, %s137_s28  ;;  %49 = vrot.lane.b32.xlu1 %v108_v7, %s138_s29 }
  0x13   :  { %55 = vrot.lane.b32.xlu2 %v109_v8, %s139_s3 }
  0x1a   :  { %61 = vrot.lane.b32.xlu0 %v110_v9, %s140_s8  ;;  %67 = vrot.lane.b32.xlu1 %v111_v10, %s141_s9 }
  0x1b   :  { %73 = vrot.lane.b32.xlu2 %v112_v11, %s142_s12 }
  0x22   :  { %79 = vrot.lane.b32.xlu0 %v113_v12, %s143_s17  ;;  %85 = vrot.lane.b32.xlu1 %v114_v13, %s144_s18 }
  0x23   :  { %91 = vrot.lane.b32.xlu2 %v115_v14, %s145_s21 }
  0x5d   :  { %v32_v16 = vpop.permute.xlu2 %31  }
  0x65   :  { %v38_v17 = vpop.permute.xlu2 %37  }
  0x6d   :  { %v56_v18 = vpop.permute.xlu2 %55  }
  0x74   :  { %v8_v19 = vpop.permute.xlu0 %7   ;;  %v20_v20 = vpop.permute.xlu1 %19  }
  0x75   :  { %10 = vst.msk [vmem:[#allocation0] sm:$0x1] %vm9_vm1, %v8_v19   ;;  %v74_v21 = vpop.permute.xlu2 %73  }
  0x7c   :  { %v14_v22 = vpop.permute.xlu0 %13   ;;  %v26_v23 = vpop.permute.xlu1 %25  }
  0x7d   :  { %16 = vst.msk [vmem:[#allocation0] sm:$0x1] %vm15_vm2, %v14_v22   ;;  %v92_v24 = vpop.permute.xlu2 %91  }
  0x7e   :  { %22 = vst.msk [vmem:[#allocation0] sm:$0x1] %vm21_vm3, %v20_v20  }
  0x7f   :  { %28 = vst.msk [vmem:[#allocation0] sm:$0x1] %vm27_vm4, %v26_v23  }
  0x80   :  { %34 = vst.msk [vmem:[#allocation0] sm:$0x1] %vm33_vm5, %v32_v16  }
  0x81   :  { %40 = vst.msk [vmem:[#allocation0] sm:$0x1] %vm39_vm6, %v38_v17  }
  0x84   :  { %v44_v25 = vpop.permute.xlu0 %43   ;;  %v50_v26 = vpop.permute.xlu1 %49  }
  0x85   :  { %46 = vst.msk [vmem:[#allocation0] sm:$0x1] %vm45_vm7, %v44_v25  }
  0x86   :  { %52 = vst.msk [vmem:[#allocation0] sm:$0x1] %vm51_vm8, %v50_v26  }
  0x87   :  { %58 = vst.msk [vmem:[#allocation0] sm:$0x1] %vm57_vm9, %v56_v18  }
  0x8c   :  { %v62_v27 = vpop.permute.xlu0 %61   ;;  %v68_v28 = vpop.permute.xlu1 %67  }
  0x8d   :  { %64 = vst.msk [vmem:[#allocation0] sm:$0x1] %vm63_vm10, %v62_v27  }
  0x8e   :  { %70 = vst.msk [vmem:[#allocation0] sm:$0x1] %vm69_vm11, %v68_v28  }
  0x8f   :  { %76 = vst.msk [vmem:[#allocation0] sm:$0x1] %vm75_vm12, %v74_v21  }
  0x94   :  { %v80_v29 = vpop.permute.xlu0 %79   ;;  %v86_v30 = vpop.permute.xlu1 %85  }
  0x95   :  { %82 = vst.msk [vmem:[#allocation0] sm:$0x1] %vm81_vm13, %v80_v29  }
  0x96   :  { %88 = vst.msk [vmem:[#allocation0] sm:$0x1] %vm87_vm14, %v86_v30  }
  0x97   :  { %94 = vst.msk [vmem:[#allocation0] sm:$0x1] %vm93_vm15, %v92_v24  }
  0x9e   :  { %v97_v31 = vld [vmem:[#allocation0] sm:$0x1] }
  0x9f   :  { %100 = vst [vmem:[%s208_s1] sm:$0x1] %v97_v31 }

// kernel: residual_forward.1
= control target key start
LH: loop header
LB: loop body
LE: loop exit
PB: predicated region body
PF: predicated region fallthrough
CT: control target
= control target key end

     0   :  { %v696_v0 = vmov 0   ;;  %vm156_vm0 = vcmask 1046528   ;;  %vm119_vm1 = vcmask 1040384   ;;  %vm354_vm5 = vcmask 64512   ;;  %s1350_s10 = inlined_call_operand.vmem [shape: f32[32,1], index: 10, kind: input, shape index: {}]   ;;  %s1351_s1 = inlined_call_operand.vmem [shape: f32[384,128], index: 1, kind: input, shape index: {}]   ;;  %s1352_s9 = inlined_call_operand.vmem [shape: f32[32,1], index: 9, kind: input, shape index: {}]   ;;  %s1353_s0 = inlined_call_operand.vmem [shape: f32[32,128], index: 0, kind: input, shape index: {}]   ;;  %s1354_s3 = inlined_call_operand.vmem [shape: f32[128,8], index: 3, kind: input, shape index: {}]   ;;  %s1355_s4 = inlined_call_operand.vmem [shape: f32[8,128], index: 4, kind: input, shape index: {}]   ;;  %s1356_s2 = inlined_call_operand.vmem [shape: f32[384,128], index: 2, kind: input, shape index: {}]   ;;  %s1357_s5 = inlined_call_operand.vmem [shape: f32[1,8], index: 5, kind: input, shape index: {}]   ;;  %s1358_s6 = inlined_call_operand.vmem [shape: f32[1,8], index: 6, kind: input, shape index: {}]   ;;  %s1359_s7 = inlined_call_operand.vmem [shape: f32[1,8], index: 7, kind: input, shape index: {}]   ;;  %s1360_s8 = inlined_call_operand.vmem [shape: f32[1,8], index: 8, kind: input, shape index: {}]   ;;  %s1361_s11 = inlined_call_operand.vmem [shape: f32[32,128], index: 11, kind: output, shape index: {}]  }
   0x1   :  { %690 = vset.pattern.permute.xlu1 %v696_v0  ;;  %689 = vset.pattern.permute.xlu0 %v696_v0  ;;  %v47_v1 = vld [vmem:[%s1350_s10 + $0x8] sm:$0xff]  ;;  %v46_v2 = vld [vmem:[%s1350_s10] sm:$0xff]  ;;  %v48_v3 = vld [vmem:[%s1350_s10 + $0x10] sm:$0xff] }
   0x2   :  { %176 = vperm.xlu1 %690, %v47_v1   ;;  %171 = vperm.xlu0 %689, %v46_v2   ;;  %v114_v4 = vld [vmem:[%s1351_s1 + $0x178] sm:$0xff]  ;;  %v113_v5 = vld [vmem:[%s1351_s1 + $0x170] sm:$0xff]  ;;  %v112_v6 = vld [vmem:[%s1351_s1 + $0x168] sm:$0xff] }
   0x3   :  { %691 = vset.pattern.permute.xlu2 %v696_v0  ;;  %251 = vmatpush.msra.mxu2 %v114_v4  ;;  %v82_v7 = vld [vmem:[%s1351_s1 + $0x78] sm:$0xff]  ;;  %v81_v9 = vld [vmem:[%s1351_s1 + $0x70] sm:$0xff]  ;;  %v43_v11 = vld [vmem:[%s1352_s9 + $0x8] sm:$0xff] }
   0x4   :  { %181 = vperm.xlu2 %691, %v48_v3   ;;  %v98_v8 = vld [vmem:[%s1351_s1 + $0xf8] sm:$0xff]  ;;  %193 = vmatpush.msra.mxu0 %v82_v7  ;;  %v97_v10 = vld [vmem:[%s1351_s1 + $0xf0] sm:$0xff]  ;;  %v42_v12 = vld [vmem:[%s1352_s9] sm:$0xff] }
   0x5   :  { %252 = vmatpush.msra.mxu2 %v113_v5  ;;  %222 = vmatpush.msra.mxu1 %v98_v8  ;;  %v111_v13 = vld [vmem:[%s1351_s1 + $0x160] sm:$0xff]  ;;  %v80_v14 = vld [vmem:[%s1351_s1 + $0x68] sm:$0xff]  ;;  %v44_v15 = vld [vmem:[%s1352_s9 + $0x10] sm:$0xff] }
   0x6   :  { %194 = vmatpush.msra.mxu0 %v81_v9  ;;  %v96_v16 = vld [vmem:[%s1351_s1 + $0xe8] sm:$0xff]  ;;  %v110_v17 = vld [vmem:[%s1351_s1 + $0x158] sm:$0xff]  ;;  %v79_v18 = vld [vmem:[%s1351_s1 + $0x60] sm:$0xff] }
   0x7   :  { %253 = vmatpush.msra.mxu2 %v112_v6  ;;  %223 = vmatpush.msra.mxu1 %v97_v10  ;;  %v95_v19 = vld [vmem:[%s1351_s1 + $0xe0] sm:$0xff]  ;;  %v109_v20 = vld [vmem:[%s1351_s1 + $0x150] sm:$0xff]  ;;  %v78_v21 = vld [vmem:[%s1351_s1 + $0x58] sm:$0xff] }
   0x8   :  { %195 = vmatpush.msra.mxu0 %v80_v14  ;;  %v94_v22 = vld [vmem:[%s1351_s1 + $0xd8] sm:$0xff]  ;;  %v108_v23 = vld [vmem:[%s1351_s1 + $0x148] sm:$0xff]  ;;  %v77_v24 = vld [vmem:[%s1351_s1 + $0x50] sm:$0xff] }
   0x9   :  { %254 = vmatpush.msra.mxu2 %v111_v13  ;;  %224 = vmatpush.msra.mxu1 %v96_v16  ;;  %v45_v25 = vld [vmem:[%s1352_s9 + $0x18] sm:$0xff]  ;;  %v107_v27 = vld [vmem:[%s1351_s1 + $0x140] sm:$0xff]  ;;  %v93_v28 = vld [vmem:[%s1351_s1 + $0xd0] sm:$0xff] }
   0xa   :  { %139 = vperm.xlu1 %690, %v43_v11   ;;  %134 = vperm.xlu0 %689, %v42_v12   ;;  %v49_v26 = vld [vmem:[%s1350_s10 + $0x18] sm:$0xff]  ;;  %v76_v29 = vld [vmem:[%s1351_s1 + $0x48] sm:$0xff]  ;;  %v75_v32 = vld [vmem:[%s1351_s1 + $0x40] sm:$0xff] }
   0xb   :  { %255 = vmatpush.msra.mxu2 %v110_v17  ;;  %196 = vmatpush.msra.mxu0 %v79_v18  ;;  %v106_v30 = vld [vmem:[%s1351_s1 + $0x138] sm:$0xff]  ;;  %v92_v31 = vld [vmem:[%s1351_s1 + $0xc8] sm:$0xff]  ;;  %v105_v33 = vld [vmem:[%s1351_s1 + $0x130] sm:$0xff] }
   0xc   :  { %144 = vperm.xlu2 %691, %v44_v15   ;;  %225 = vmatpush.msra.mxu1 %v95_v19  ;;  %v91_v34 = vld [vmem:[%s1351_s1 + $0xc0] sm:$0xff]  ;;  %v74_v35 = vld [vmem:[%s1351_s1 + $0x38] sm:$0xff]  ;;  %v104_v36 = vld [vmem:[%s1351_s1 + $0x128] sm:$0xff] }
   0xd   :  { %256 = vmatpush.msra.mxu2 %v109_v20  ;;  %197 = vmatpush.msra.mxu0 %v78_v21  ;;  %v90_v37 = vld [vmem:[%s1351_s1 + $0xb8] sm:$0xff]  ;;  %v73_v38 = vld [vmem:[%s1351_s1 + $0x30] sm:$0xff]  ;;  %v103_v39 = vld [vmem:[%s1351_s1 + $0x120] sm:$0xff] }
   0xe   :  { %226 = vmatpush.msra.mxu1 %v94_v22  ;;  %v89_v40 = vld [vmem:[%s1351_s1 + $0xb0] sm:$0xff]  ;;  %v102_v41 = vld [vmem:[%s1351_s1 + $0x118] sm:$0xff]  ;;  %v72_v43 = vld [vmem:[%s1351_s1 + $0x28] sm:$0xff] }
   0xf   :  { %257 = vmatpush.msra.mxu2 %v108_v23  ;;  %198 = vmatpush.msra.mxu0 %v77_v24  ;;  %v101_v42 = vld [vmem:[%s1351_s1 + $0x110] sm:$0xff]  ;;  %v88_v44 = vld [vmem:[%s1351_s1 + $0xa8] sm:$0xff]  ;;  %v71_v46 = vld [vmem:[%s1351_s1 + $0x20] sm:$0xff] }
  0x10   :  { %227 = vmatpush.msra.mxu1 %v93_v28  ;;  %v100_v45 = vld [vmem:[%s1351_s1 + $0x108] sm:$0xff]  ;;  %v87_v47 = vld [vmem:[%s1351_s1 + $0xa0] sm:$0xff]  ;;  %v70_v49 = vld [vmem:[%s1351_s1 + $0x18] sm:$0xff] }
  0x11   :  { %258 = vmatpush.msra.mxu2 %v107_v27  ;;  %199 = vmatpush.msra.mxu0 %v76_v29  ;;  %v99_v48 = vld [vmem:[%s1351_s1 + $0x100] sm:$0xff]  ;;  %v86_v50 = vld [vmem:[%s1351_s1 + $0x98] sm:$0xff]  ;;  %v69_v51 = vld [vmem:[%s1351_s1 + $0x10] sm:$0xff] }
  0x12   :  { %149 = vperm.xlu1 %690, %v45_v25   ;;  %186 = vperm.xlu0 %689, %v49_v26   ;;  %v85_v52 = vld [vmem:[%s1351_s1 + $0x90] sm:$0xff]  ;;  %v68_v53 = vld [vmem:[%s1351_s1 + $0x8] sm:$0xff]  ;;  %v67_v55 = vld [vmem:[%s1351_s1] sm:$0xff] }
  0x13   :  { %259 = vmatpush.msra.mxu2 %v106_v30  ;;  %228 = vmatpush.msra.mxu1 %v92_v31  ;;  %v84_v54 = vld [vmem:[%s1351_s1 + $0x88] sm:$0xff]  ;;  %v83_v56 = vld [vmem:[%s1351_s1 + $0x80] sm:$0xff]  ;;  %v942_v61 = vld [vmem:[%s1353_s0 + $0x10] sm:$0xff] }
  0x14   :  { %200 = vmatpush.msra.mxu0 %v75_v32  ;;  %v928_v57 = vld [vmem:[%s1353_s0] sm:$0xff]  ;;  %v934_v58 = vld [vmem:[%s1353_s0 + $0x8] sm:$0xff]  ;;  %v160_v0 = vrot.slane %v942_v61, 1  ;;  %v954_v3 = vld [vmem:[%s1353_s0 + $0x18] sm:$0xff]  ;;  %v123_v18 = vrot.slane %v942_v61, 7 }
  0x15   :  { %260 = vmatpush.msra.mxu2 %v105_v33  ;;  %229 = vmatpush.msra.mxu1 %v91_v34  ;;  %v157_v59 = vrot.slane %v928_v57, 1  ;;  %v158_v60 = vrot.slane %v934_v58, 1  ;;  %v120_v2 = vrot.slane %v928_v57, 7  ;;  %v162_v9 = vrot.slane %v954_v3, 1  ;;  %v992_v29 = vld [vmem:[%s1354_s3 + $0x78] sm:$0xff]  ;;  %v998_v30 = vld [vmem:[%s1354_s3 + $0x70] sm:$0xff] }
  0x16   :  { %201 = vmatpush.msra.mxu0 %v74_v35  ;;  %v121_v11 = vrot.slane %v934_v58, 7  ;;  %v125_v25 = vrot.slane %v954_v3, 7  ;;  %305 = vmatpush.msra.mxu3 %v992_v29  ;;  %v1004_v31 = vld [vmem:[%s1354_s3 + $0x68] sm:$0xff]  ;;  %v1010_v32 = vld [vmem:[%s1354_s3 + $0x60] sm:$0xff]  ;;  %v1016_v33 = vld [vmem:[%s1354_s3 + $0x58] sm:$0xff] }
  0x17   :  { %261 = vmatpush.msra.mxu2 %v104_v36  ;;  %230 = vmatpush.msra.mxu1 %v90_v37  ;;  %v159_v62 = vsel %vm156_vm0, %v157_v59, %v158_v60  ;;  %v161_v5 = vsel %vm156_vm0, %v158_v60, %v160_v0  ;;  %v131_v6 = vsel %vm119_vm1, 0.0, %v120_v2  ;;  %v163_v13 = vsel %vm156_vm0, %v160_v0, %v162_v9  ;;  %v1022_v35 = vld [vmem:[%s1354_s3 + $0x50] sm:$0xff]  ;;  %v1028_v36 = vld [vmem:[%s1354_s3 + $0x48] sm:$0xff]  ;;  %v1034_v37 = vld [vmem:[%s1354_s3 + $0x40] sm:$0xff] }
  0x18   :  { %202 = vmatpush.msra.mxu0 %v73_v38  ;;  %v122_v15 = vsel %vm119_vm1, %v120_v2, %v121_v11  ;;  %v124_v20 = vsel %vm119_vm1, %v121_v11, %v123_v18  ;;  %v168_v22 = vsel %vm156_vm0, %v162_v9, 0.0  ;;  %v126_v27 = vsel %vm119_vm1, %v123_v18, %v125_v25  ;;  %306 = vmatpush.msra.mxu3 %v998_v30 }
  0x19   :  { %262 = vmatpush.msra.mxu2 %v103_v39  ;;  %231 = vmatpush.msra.mxu1 %v89_v40  ;;  %v1040_v39 = vld [vmem:[%s1354_s3 + $0x38] sm:$0xff]  ;;  %v1046_v40 = vld [vmem:[%s1354_s3 + $0x30] sm:$0xff] }
  0x1a   :  { %203 = vmatpush.msra.mxu0 %v72_v43  ;;  %307 = vmatpush.msra.mxu3 %v1004_v31 }
  0x1b   :  { %263 = vmatpush.msra.mxu2 %v102_v41  ;;  %232 = vmatpush.msra.mxu1 %v88_v44  ;;  %v1057_v44 = vld [vmem:[%s1354_s3 + $0x20] sm:$0xff] }
  0x1c   :  { %204 = vmatpush.msra.mxu0 %v71_v46  ;;  %308 = vmatpush.msra.mxu3 %v1010_v32 }
  0x1d   :  { %264 = vmatpush.msra.mxu2 %v101_v42  ;;  %233 = vmatpush.msra.mxu1 %v87_v47  ;;  %v1051_v42 = vld [vmem:[%s1354_s3 + $0x28] sm:$0xff]  ;;  %v1069_v47 = vld [vmem:[%s1354_s3 + $0x10] sm:$0xff] }
  0x1e   :  { %205 = vmatpush.msra.mxu0 %v70_v49  ;;  %309 = vmatpush.msra.mxu3 %v1016_v33  ;;  %v1075_v49 = vld [vmem:[%s1354_s3 + $0x8] sm:$0xff] }
  0x1f   :  { %265 = vmatpush.msra.mxu2 %v100_v45  ;;  %234 = vmatpush.msra.mxu1 %v86_v50  ;;  %v1063_v45 = vld [vmem:[%s1354_s3 + $0x18] sm:$0xff]  ;;  %v1081_v50 = vld [vmem:[%s1354_s3] sm:$0xff] }
  0x20   :  { %206 = vmatpush.msra.mxu0 %v69_v51  ;;  %310 = vmatpush.msra.mxu3 %v1022_v35 }
  0x21   :  { %266 = vmatpush.msra.mxu2 %v99_v48  ;;  %235 = vmatpush.msra.mxu1 %v85_v52 }
  0x22   :  { %207 = vmatpush.msra.mxu0 %v68_v53  ;;  %311 = vmatpush.msra.mxu3 %v1028_v36 }
  0x23   :  { %236 = vmatpush.msra.mxu1 %v84_v54 }
  0x24   :  { %208 = vmatpush.msra.mxu0 %v67_v55  ;;  %312 = vmatpush.msra.mxu3 %v1034_v37 }
  0x25   :  { %237 = vmatpush.msra.mxu1 %v83_v56 }
  0x26   :  { %238 = vmatmul.f32.vlgmr.msra.gmra.mxu1 %v928_v57  ;;  %313 = vmatpush.msra.mxu3 %v1040_v39 }
  0x28   :  { %314 = vmatpush.msra.mxu3 %v1046_v40 }
  0x2a   :  { %315 = vmatpush.msra.mxu3 %v1051_v42 }
  0x2c   :  { %316 = vmatpush.msra.mxu3 %v1057_v44 }
  0x2e   :  { %241 = vmatmul.f32.gmra.mxu1 %v934_v58  ;;  %317 = vmatpush.msra.mxu3 %v1063_v45 }
  0x30   :  { %318 = vmatpush.msra.mxu3 %v1069_v47 }
  0x32   :  { %319 = vmatpush.msra.mxu3 %v1075_v49 }
  0x34   :  { %320 = vmatpush.msra.mxu3 %v1081_v50 }
  0x36   :  { %244 = vmatmul.f32.gmra.mxu1 %v942_v61 }
  0x3e   :  { %247 = vmatmul.f32.gmra.mxu1 %v954_v3 }
  0x5e   :  { %v967_v12 = vpop.permute.xlu2 %181 }
  0x5f   :  { %v191_v16 = vmul.f32 %v967_v12, %v163_v13 }
  0x66   :  { %v976_v19 = vpop.permute.xlu2 %144 }
  0x67   :  { %v154_v23 = vmul.f32 %v976_v19, %v124_v20 }
  0x74   :  { %v946_v63 = vpop.permute.xlu0 %171  ;;  %v957_v4 = vpop.permute.xlu1 %176 }
  0x75   :  { %v189_v1 = vmul.f32 %v946_v63, %v159_v62  ;;  %v190_v7 = vmul.f32 %v957_v4, %v161_v5 }
  0x77   :  { %267 = vmatmul.f32.vlgmr.msra.gmra.mxu2 %v189_v1 }
  0x7c   :  { %v962_v8 = vpop.permute.xlu0 %134  ;;  %v970_v14 = vpop.permute.xlu1 %139 }
  0x7d   :  { %v152_v10 = vmul.f32 %v962_v8, %v131_v6  ;;  %v153_v17 = vmul.f32 %v970_v14, %v122_v15 }
  0x7f   :  { %209 = vmatmul.f32.vlgmr.msra.gmra.mxu0 %v152_v10  ;;  %270 = vmatmul.f32.gmra.mxu2 %v190_v7 }
  0x84   :  { %v979_v21 = vpop.permute.xlu0 %186  ;;  %v985_v26 = vpop.permute.xlu1 %149 }
  0x85   :  { %v192_v24 = vmul.f32 %v979_v21, %v168_v22  ;;  %v155_v28 = vmul.f32 %v985_v26, %v126_v27 }
  0x87   :  { %212 = vmatmul.f32.gmra.mxu0 %v153_v17  ;;  %273 = vmatmul.f32.gmra.mxu2 %v191_v16 }
  0x8f   :  { %215 = vmatmul.f32.gmra.mxu0 %v154_v23  ;;  %276 = vmatmul.f32.gmra.mxu2 %v192_v24 }
  0x97   :  { %218 = vmatmul.f32.gmra.mxu0 %v155_v28 }
  0xa3   :  { %v239_v34 = vpop.f32.mrf.mxu1 }
  0xab   :  { %v242_v43 = vpop.f32.mrf.mxu1 }
  0xb3   :  { %v245_v51 = vpop.f32.mrf.mxu1 }
  0xbb   :  { %v248_v0 = vpop.f32.mrf.mxu1 }
  0xfa   :  { %v268_v38 = vpop.f32.mrf.mxu2 }
  0xfc   :  { %v210_v41 = vpop.f32.mrf.mxu0 }
  0xfd   :  { %v240_v55 = vadd.f32 %v239_v34, %v210_v41 }
  0xff   :  { %v1087_v60 = vadd.f32 %v268_v38, %v240_v55 }
 0x101   :  { %v291_v5 = vmul.f32 %v1087_v60, %v1087_v60 }
 0x102   :  { %v271_v46 = vpop.f32.mrf.mxu2 }
 0x104   :  { %v213_v48 = vpop.f32.mrf.mxu0 }
 0x105   :  { %v243_v52 = vadd.f32 %v242_v43, %v213_v48 }
 0x107   :  { %v1085_v59 = vadd.f32 %v271_v46, %v243_v52 }
 0x109   :  { %v292_v1 = vmul.f32 %v1085_v59, %v1085_v59  ;;  %v282_v6 = vadd.f32 %v1085_v59, %v1087_v60 }
 0x10a   :  { %v274_v53 = vpop.f32.mrf.mxu2 }
 0x10b   :  { %v295_v11 = vadd.f32 %v292_v1, %v291_v5  ;;  %v1114_v1 = vld [vmem:[%s1355_s4] sm:$0xff]  ;;  %v422_v5 = vld [vmem:[%s1356_s2 + $0xf0] sm:$0xff] }
 0x10c   :  { %v216_v54 = vpop.f32.mrf.mxu0  ;;  %373 = vmatpush.msrb.mxu3 %v1114_v1 }
 0x10d   :  { %v246_v56 = vadd.f32 %v245_v51, %v216_v54 }
 0x10f   :  { %v1089_v62 = vadd.f32 %v274_v53, %v246_v56 }
 0x111   :  { %v293_v7 = vmul.f32 %v1089_v62, %v1089_v62  ;;  %v283_v13 = vadd.f32 %v282_v6, %v1089_v62  ;;  %v439_v6 = vld [vmem:[%s1356_s2 + $0x178] sm:$0xff] }
 0x112   :  { %v277_v10 = vpop.f32.mrf.mxu2  ;;  %534 = vmatpush.msrb.mxu2 %v439_v6  ;;  %v410_v6 = vld [vmem:[%s1356_s2 + $0x90] sm:$0xff] }
 0x113   :  { %v296_v16 = vadd.f32 %v295_v11, %v293_v7  ;;  %v407_v7 = vld [vmem:[%s1356_s2 + $0x78] sm:$0xff] }
 0x114   :  { %v219_v2 = vpop.f32.mrf.mxu0  ;;  %476 = vmatpush.msrb.mxu0 %v407_v7  ;;  %v428_v7 = vld [vmem:[%s1356_s2 + $0x120] sm:$0xff] }
 0x115   :  { %v249_v9 = vadd.f32 %v248_v0, %v219_v2  ;;  %v423_v2 = vld [vmem:[%s1356_s2 + $0xf8] sm:$0xff] }
 0x116   :  { %505 = vmatpush.msrb.mxu1 %v423_v2 }
 0x117   :  { %v1100_v15 = vadd.f32 %v277_v10, %v249_v9  ;;  %v438_v9 = vld [vmem:[%s1356_s2 + $0x170] sm:$0xff] }
 0x118   :  { %v406_v10 = vld [vmem:[%s1356_s2 + $0x70] sm:$0xff]  ;;  %506 = vmatpush.msrb.mxu1 %v422_v5  ;;  %535 = vmatpush.msrb.mxu2 %v438_v9  ;;  %v409_v9 = vld [vmem:[%s1356_s2 + $0x88] sm:$0xff] }
 0x119   :  { %v284_v17 = vadd.f32 %v283_v13, %v1100_v15  ;;  %v294_v18 = vmul.f32 %v1100_v15, %v1100_v15  ;;  %v405_v13 = vld [vmem:[%s1356_s2 + $0x68] sm:$0xff]  ;;  %477 = vmatpush.msrb.mxu0 %v406_v10  ;;  %v427_v10 = vld [vmem:[%s1356_s2 + $0x118] sm:$0xff] }
 0x11b   :  { %v285_v20 = vrot.slane %v284_v17, 4  ;;  %v297_v22 = vadd.f32 %v296_v16, %v294_v18  ;;  %v436_v18 = vld [vmem:[%s1356_s2 + $0x160] sm:$0xff]  ;;  %478 = vmatpush.msrb.mxu0 %v405_v13  ;;  %v426_v13 = vld [vmem:[%s1356_s2 + $0x110] sm:$0xff] }
 0x11d   :  { %v286_v23 = vadd.f32 %v285_v20, %v284_v17  ;;  %v298_v24 = vrot.slane %v297_v22, 4  ;;  %v420_v17 = vld [vmem:[%s1356_s2 + $0xe0] sm:$0xff] }
 0x11e   :  { %v404_v20 = vld [vmem:[%s1356_s2 + $0x60] sm:$0xff] }
 0x11f   :  { %v287_v25 = vrot.slane %v286_v23, 2  ;;  %v299_v27 = vadd.f32 %v298_v24, %v297_v22  ;;  %v403_v24 = vld [vmem:[%s1356_s2 + $0x58] sm:$0xff]  ;;  %479 = vmatpush.msrb.mxu0 %v404_v20  ;;  %v424_v20 = vld [vmem:[%s1356_s2 + $0x100] sm:$0xff] }
 0x121   :  { %v288_v28 = vadd.f32 %v287_v25, %v286_v23  ;;  %v300_v34 = vrot.slane %v299_v27, 2  ;;  %v435_v23 = vld [vmem:[%s1356_s2 + $0x158] sm:$0xff]  ;;  %480 = vmatpush.msrb.mxu0 %v403_v24 }
 0x123   :  { %v289_v38 = vrot.slane %v288_v28, 1  ;;  %v301_v41 = vadd.f32 %v300_v34, %v299_v27  ;;  %v434_v27 = vld [vmem:[%s1356_s2 + $0x150] sm:$0xff] }
 0x125   :  { %v302_v43 = vrot.slane %v301_v41, 1  ;;  %v290_v46 = vadd.f32 %v289_v38, %v288_v28  ;;  %v402_v28 = vld [vmem:[%s1356_s2 + $0x50] sm:$0xff]  ;;  %v433_v38 = vld [vmem:[%s1356_s2 + $0x148] sm:$0xff] }
 0x126   :  { %481 = vmatpush.msrb.mxu0 %v402_v28 }
 0x127   :  { %v303_v48 = vadd.f32 %v302_v43, %v301_v41  ;;  %v401_v41 = vld [vmem:[%s1356_s2 + $0x48] sm:$0xff]  ;;  %v416_v43 = vld [vmem:[%s1356_s2 + $0xc0] sm:$0xff] }
 0x128   :  { %482 = vmatpush.msrb.mxu0 %v401_v41 }
 0x129   :  { %v304_v51 = vsel %vm119_vm1, %v290_v46, %v303_v48  ;;  %v432_v46 = vld [vmem:[%s1356_s2 + $0x140] sm:$0xff] }
 0x12a   :  { %321 = vmatmul.f32.vlgmr.msra.gmra.mxu3 %v304_v51  ;;  %v400_v48 = vld [vmem:[%s1356_s2 + $0x40] sm:$0xff]  ;;  %v415_v51 = vld [vmem:[%s1356_s2 + $0xb8] sm:$0xff] }
 0x12b   :  { %588 = vmatpush.msra.mxu3 %v992_v29  ;;  %v421_v29 = vld [vmem:[%s1356_s2 + $0xe8] sm:$0xff]  ;;  %483 = vmatpush.msrb.mxu0 %v400_v48 }
 0x12c   :  { %507 = vmatpush.msrb.mxu1 %v421_v29  ;;  %v396_v29 = vld [vmem:[%s1356_s2 + $0x20] sm:$0xff] }
 0x12d   :  { %589 = vmatpush.msra.mxu3 %v998_v30  ;;  %v437_v30 = vld [vmem:[%s1356_s2 + $0x168] sm:$0xff] }
 0x12e   :  { %536 = vmatpush.msrb.mxu2 %v437_v30  ;;  %508 = vmatpush.msrb.mxu1 %v420_v17  ;;  %v408_v30 = vld [vmem:[%s1356_s2 + $0x80] sm:$0xff]  ;;  %v425_v17 = vld [vmem:[%s1356_s2 + $0x108] sm:$0xff] }
 0x12f   :  { %590 = vmatpush.msra.mxu3 %v1004_v31  ;;  %v419_v31 = vld [vmem:[%s1356_s2 + $0xd8] sm:$0xff] }
 0x130   :  { %537 = vmatpush.msrb.mxu2 %v436_v18  ;;  %509 = vmatpush.msrb.mxu1 %v419_v31  ;;  %v393_v18 = vld [vmem:[%s1356_s2 + $0x8] sm:$0xff] }
 0x131   :  { %591 = vmatpush.msra.mxu3 %v1010_v32  ;;  %v418_v32 = vld [vmem:[%s1356_s2 + $0xd0] sm:$0xff] }
 0x132   :  { %538 = vmatpush.msrb.mxu2 %v435_v23  ;;  %510 = vmatpush.msrb.mxu1 %v418_v32 }
 0x133   :  { %592 = vmatpush.msra.mxu3 %v1016_v33  ;;  %v417_v33 = vld [vmem:[%s1356_s2 + $0xc8] sm:$0xff] }
 0x134   :  { %539 = vmatpush.msrb.mxu2 %v434_v27  ;;  %511 = vmatpush.msrb.mxu1 %v417_v33 }
 0x135   :  { %593 = vmatpush.msra.mxu3 %v1022_v35 }
 0x136   :  { %540 = vmatpush.msrb.mxu2 %v433_v38  ;;  %512 = vmatpush.msrb.mxu1 %v416_v43 }
 0x137   :  { %594 = vmatpush.msra.mxu3 %v1028_v36 }
 0x138   :  { %541 = vmatpush.msrb.mxu2 %v432_v46  ;;  %513 = vmatpush.msrb.mxu1 %v415_v51 }
 0x139   :  { %595 = vmatpush.msra.mxu3 %v1034_v37  ;;  %v414_v37 = vld [vmem:[%s1356_s2 + $0xb0] sm:$0xff] }
 0x13a   :  { %514 = vmatpush.msrb.mxu1 %v414_v37 }
 0x13b   :  { %596 = vmatpush.msra.mxu3 %v1040_v39  ;;  %v280_v39 = vld [vmem:[%s1357_s5] sm:$0x1] }
 0x13d   :  { %597 = vmatpush.msra.mxu3 %v1046_v40  ;;  %v281_v40 = vld [vmem:[%s1358_s6] sm:$0x1] }
 0x13f   :  { %598 = vmatpush.msra.mxu3 %v1051_v42 }
 0x141   :  { %599 = vmatpush.msra.mxu3 %v1057_v44 }
 0x143   :  { %600 = vmatpush.msra.mxu3 %v1063_v45  ;;  %v412_v45 = vld [vmem:[%s1356_s2 + $0xa0] sm:$0xff] }
 0x145   :  { %601 = vmatpush.msra.mxu3 %v1069_v47  ;;  %v430_v47 = vld [vmem:[%s1356_s2 + $0x130] sm:$0xff] }
 0x147   :  { %602 = vmatpush.msra.mxu3 %v1075_v49  ;;  %v398_v49 = vld [vmem:[%s1356_s2 + $0x30] sm:$0xff] }
 0x149   :  { %603 = vmatpush.msra.mxu3 %v1081_v50  ;;  %v411_v50 = vld [vmem:[%s1356_s2 + $0x98] sm:$0xff] }
 0x1ad   :  { %v322_v52 = vpop.f32.mrf.mxu3 }
 0x1ae   :  { %v1106_v53 = vmul.f32 0.001953125, %v322_v52  ;;  %v431_v52 = vld [vmem:[%s1356_s2 + $0x138] sm:$0xff] }
 0x1af   :  { %542 = vmatpush.msrb.mxu2 %v431_v52 }
 0x1b0   :  { %v326_v54 = vmul.f32 %v1106_v53, %v1106_v53 }
 0x1b1   :  { %543 = vmatpush.msrb.mxu2 %v430_v47 }
 0x1b2   :  { %v328_v55 = vrot.slane %v326_v54, 7  ;;  %v399_v54 = vld [vmem:[%s1356_s2 + $0x38] sm:$0xff] }
 0x1b3   :  { %484 = vmatpush.msrb.mxu0 %v399_v54 }
 0x1b4   :  { %v330_v56 = vsub.f32 %v1106_v53, %v328_v55  ;;  %v413_v55 = vld [vmem:[%s1356_s2 + $0xa8] sm:$0xff] }
 0x1b5   :  { %515 = vmatpush.msrb.mxu1 %v413_v55  ;;  %485 = vmatpush.msrb.mxu0 %v398_v49 }
 0x1b6   :  { %v331_v0 = vadd.f32 1e-05, %v330_v56 }
 0x1b7   :  { %516 = vmatpush.msrb.mxu1 %v412_v45 }
 0x1b8   :  { %692 = vrsqrt.f32 %v331_v0  ;;  %vm338_vm3 = vweird.f32 %v331_v0 }
 0x1b9   :  { %517 = vmatpush.msrb.mxu1 %v411_v50 }
 0x1bb   :  { %518 = vmatpush.msrb.mxu1 %v410_v6 }
 0x1bd   :  { %519 = vmatpush.msrb.mxu1 %v409_v9 }
 0x1be   :  { %v693_v11 = vpop.eup %692 }
 0x1bf   :  { %v333_v16 = vmul.f32 %v693_v11, %v331_v0  ;;  %vm339_vm2 = vweird.f32 %v693_v11  ;;  %520 = vmatpush.msrb.mxu1 %v408_v30 }
 0x1c0   :  { %vm340_vm4 = vmor %vm338_vm3, %vm339_vm2 }
 0x1c1   :  { %v334_v22 = vmul.f32 %v693_v11, %v333_v16  ;;  %v394_v16 = vld [vmem:[%s1356_s2 + $0x10] sm:$0xff] }
 0x1c3   :  { %v335_v25 = vmul.f32 0.5, %v334_v22  ;;  %v392_v22 = vld [vmem:[%s1356_s2] sm:$0xff] }
 0x1c5   :  { %v336_v34 = vsub.f32 1.5, %v335_v25 }
 0x1c7   :  { %v337_v35 = vmul.f32 %v693_v11, %v336_v34 }
 0x1c9   :  { %v341_v36 = vsel %vm340_vm4, %v693_v11, %v337_v35  ;;  %v395_v11 = vld [vmem:[%s1356_s2 + $0x18] sm:$0xff] }
 0x1ca   :  { %343 = vst [vmem:[#allocation1] sm:$0xff] %v341_v36 }
 0x1d1   :  { %v345_v56 = vld [vmem:[#allocation1 + $0x1] ss:$9 sm:$0xff] }
 0x1d2   :  { %v347_v0 = vmul.f32 %v345_v56, %v280_v39 }
 0x1d4   :  { %v348_v2 = vmul.f32 %v347_v0, %v1106_v53  ;;  %v429_v53 = vld [vmem:[%s1356_s2 + $0x128] sm:$0xff] }
 0x1d5   :  { %544 = vmatpush.msrb.mxu2 %v429_v53 }
 0x1d6   :  { %v349_v42 = vsub.f32 %v281_v40, %v348_v2 }
 0x1d7   :  { %545 = vmatpush.msrb.mxu2 %v428_v7 }
 0x1d8   :  { %v351_v5 = vperm.slane %v349_v42, 0 }
 0x1d9   :  { %546 = vmatpush.msrb.mxu2 %v427_v10 }
 0x1da   :  { %v353_v44 = vsel %vm119_vm1, %v347_v0, %v351_v5 }
 0x1db   :  { %686 = vmatmul.msk.f32.vlgmr.msrb.gmra.mxu3 %vm354_vm5, %v353_v44  ;;  %547 = vmatpush.msrb.mxu2 %v426_v13 }
 0x1dc   :  { %655 = vmatpush.msrb.mxu3 %v1114_v1  ;;  %v397_v1 = vld [vmem:[%s1356_s2 + $0x28] sm:$0xff] }
 0x1dd   :  { %486 = vmatpush.msrb.mxu0 %v397_v1  ;;  %548 = vmatpush.msrb.mxu2 %v425_v17 }
 0x1df   :  { %487 = vmatpush.msrb.mxu0 %v396_v29  ;;  %549 = vmatpush.msrb.mxu2 %v424_v20 }
 0x1e1   :  { %488 = vmatpush.msrb.mxu0 %v395_v11 }
 0x1e3   :  { %489 = vmatpush.msrb.mxu0 %v394_v16 }
 0x1e5   :  { %490 = vmatpush.msrb.mxu0 %v393_v18 }
 0x1e7   :  { %491 = vmatpush.msrb.mxu0 %v392_v22 }
 0x25e   :  { %v375_v31 = vpop.f32.mrf.mxu3 }
 0x25f   :  { %v378_v23 = vperm.slane %v375_v31, 0  ;;  %v383_v32 = vperm.slane %v375_v31, 1 }
 0x261   :  { %v380_v24 = vmul.f32 %v378_v23, %v1085_v59  ;;  %v381_v25 = vmul.f32 %v378_v23, %v1089_v62  ;;  %v379_v27 = vmul.f32 %v378_v23, %v1087_v60  ;;  %v382_v35 = vmul.f32 %v378_v23, %v1100_v15 }
 0x263   :  { %v385_v28 = vadd.f32 %v383_v32, %v380_v24  ;;  %v386_v34 = vadd.f32 %v383_v32, %v381_v25  ;;  %v384_v33 = vadd.f32 %v383_v32, %v379_v27  ;;  %v387_v52 = vadd.f32 %v383_v32, %v382_v35 }
 0x265   :  { %v389_v38 = vmax.f32 %v385_v28, 0.0  ;;  %v388_v41 = vmax.f32 %v384_v33, 0.0  ;;  %v390_v43 = vmax.f32 %v386_v34, 0.0  ;;  %v391_v55 = vmax.f32 %v387_v52, 0.0 }
 0x267   :  { %v460_v46 = vrot.slane %v388_v41, 1  ;;  %521 = vmatmul.f32.vlgmr.msrb.gmra.mxu1 %v388_v41  ;;  %v444_v48 = vrot.slane %v388_v41, 7  ;;  %v461_v36 = vrot.slane %v389_v38, 1  ;;  %v445_v54 = vrot.slane %v389_v38, 7 }
 0x268   :  { %v463_v37 = vrot.slane %v390_v43, 1  ;;  %v447_v40 = vrot.slane %v390_v43, 7  ;;  %v465_v2 = vrot.slane %v391_v55, 1  ;;  %v449_v44 = vrot.slane %v391_v55, 7 }
 0x269   :  { %v455_v51 = vsel %vm119_vm1, 0.0, %v444_v48  ;;  %v462_v59 = vsel %vm156_vm0, %v460_v46, %v461_v36  ;;  %v446_v15 = vsel %vm119_vm1, %v444_v48, %v445_v54 }
 0x26a   :  { %v456_v62 = vmul.f32 %v455_v51, %v962_v8  ;;  %v472_v60 = vmul.f32 %v462_v59, %v946_v63  ;;  %v464_v39 = vsel %vm156_vm0, %v461_v36, %v463_v37  ;;  %v457_v56 = vmul.f32 %v446_v15, %v970_v14 }
 0x26b   :  { %v473_v0 = vmul.f32 %v464_v39, %v957_v4  ;;  %v448_v63 = vsel %vm119_vm1, %v445_v54, %v447_v40  ;;  %v466_v8 = vsel %vm156_vm0, %v463_v37, %v465_v2  ;;  %v450_v14 = vsel %vm119_vm1, %v447_v40, %v449_v44 }
 0x26c   :  { %492 = vmatmul.f32.vlgmr.msrb.gmra.mxu0 %v456_v62  ;;  %550 = vmatmul.f32.vlgmr.msrb.gmra.mxu2 %v472_v60  ;;  %v458_v42 = vmul.f32 %v448_v63, %v976_v19  ;;  %v474_v5 = vmul.f32 %v466_v8, %v967_v12  ;;  %v471_v4 = vsel %vm156_vm0, %v465_v2, 0.0  ;;  %v459_v45 = vmul.f32 %v450_v14, %v985_v26  ;;  %v563_v14 = vld [vmem:[%s1359_s7] sm:$0x1] }
 0x26d   :  { %v475_v47 = vmul.f32 %v471_v4, %v979_v21 }
 0x26f   :  { %524 = vmatmul.f32.gmra.mxu1 %v389_v38 }
 0x274   :  { %495 = vmatmul.f32.gmra.mxu0 %v457_v56  ;;  %553 = vmatmul.f32.gmra.mxu2 %v473_v0 }
 0x277   :  { %527 = vmatmul.f32.gmra.mxu1 %v390_v43 }
 0x27c   :  { %498 = vmatmul.f32.gmra.mxu0 %v458_v42  ;;  %556 = vmatmul.f32.gmra.mxu2 %v474_v5 }
 0x27f   :  { %530 = vmatmul.f32.gmra.mxu1 %v391_v55 }
 0x284   :  { %501 = vmatmul.f32.gmra.mxu0 %v459_v45  ;;  %559 = vmatmul.f32.gmra.mxu2 %v475_v47  ;;  %v564_v47 = vld [vmem:[%s1360_s8] sm:$0x1] }
 0x2e4   :  { %v522_v49 = vpop.f32.mrf.mxu1 }
 0x2e9   :  { %v493_v50 = vpop.f32.mrf.mxu0 }
 0x2ea   :  { %v523_v10 = vadd.f32 %v522_v49, %v493_v50 }
 0x2ec   :  { %v525_v19 = vpop.f32.mrf.mxu1 }
 0x2ef   :  { %v551_v53 = vpop.f32.mrf.mxu2 }
 0x2f0   :  { %v1309_v13 = vadd.f32 %v551_v53, %v523_v10 }
 0x2f1   :  { %v496_v1 = vpop.f32.mrf.mxu0 }
 0x2f2   :  { %v526_v29 = vadd.f32 %v525_v19, %v496_v1  ;;  %v574_v18 = vmul.f32 %v1309_v13, %v1309_v13 }
 0x2f4   :  { %v528_v7 = vpop.f32.mrf.mxu1 }
 0x2f7   :  { %v554_v12 = vpop.f32.mrf.mxu2 }
 0x2f8   :  { %v1307_v11 = vadd.f32 %v554_v12, %v526_v29 }
 0x2f9   :  { %v499_v6 = vpop.f32.mrf.mxu0 }
 0x2fa   :  { %v529_v30 = vadd.f32 %v528_v7, %v499_v6  ;;  %v575_v16 = vmul.f32 %v1307_v11, %v1307_v11  ;;  %v565_v20 = vadd.f32 %v1307_v11, %v1309_v13 }
 0x2fc   :  { %v531_v17 = vpop.f32.mrf.mxu1  ;;  %v578_v24 = vadd.f32 %v575_v16, %v574_v18 }
 0x2ff   :  { %v557_v9 = vpop.f32.mrf.mxu2 }
 0x300   :  { %v1311_v26 = vadd.f32 %v557_v9, %v529_v30 }
 0x301   :  { %v502_v21 = vpop.f32.mrf.mxu0 }
 0x302   :  { %v576_v22 = vmul.f32 %v1311_v26, %v1311_v26  ;;  %v532_v31 = vadd.f32 %v531_v17, %v502_v21  ;;  %v566_v25 = vadd.f32 %v565_v20, %v1311_v26 }
 0x304   :  { %v579_v27 = vadd.f32 %v578_v24, %v576_v22 }
 0x307   :  { %v560_v23 = vpop.f32.mrf.mxu2 }
 0x308   :  { %v561_v32 = vadd.f32 %v560_v23, %v532_v31 }
 0x30a   :  { %v567_v28 = vadd.f32 %v566_v25, %v561_v32  ;;  %v577_v34 = vmul.f32 %v561_v32, %v561_v32 }
 0x30c   :  { %v568_v33 = vrot.slane %v567_v28, 4  ;;  %v580_v38 = vadd.f32 %v579_v27, %v577_v34 }
 0x30e   :  { %v569_v41 = vadd.f32 %v568_v33, %v567_v28  ;;  %v581_v35 = vrot.slane %v580_v38, 4 }
 0x310   :  { %v570_v43 = vrot.slane %v569_v41, 2  ;;  %v582_v46 = vadd.f32 %v581_v35, %v580_v38 }
 0x312   :  { %v571_v48 = vadd.f32 %v570_v43, %v569_v41  ;;  %v583_v36 = vrot.slane %v582_v46, 2 }
 0x314   :  { %v572_v51 = vrot.slane %v571_v48, 1  ;;  %v584_v59 = vadd.f32 %v583_v36, %v582_v46 }
 0x316   :  { %v585_v62 = vrot.slane %v584_v59, 1  ;;  %v573_v60 = vadd.f32 %v572_v51, %v571_v48 }
 0x318   :  { %v586_v52 = vadd.f32 %v585_v62, %v584_v59 }
 0x31a   :  { %v587_v54 = vsel %vm119_vm1, %v573_v60, %v586_v52 }
 0x31b   :  { %604 = vmatmul.f32.vlgmr.msra.gmra.mxu3 %v587_v54 }
 0x39e   :  { %v605_v37 = vpop.f32.mrf.mxu3 }
 0x39f   :  { %v608_v55 = vmul.f32 0.001953125, %v605_v37 }
 0x3a1   :  { %v609_v15 = vmul.f32 %v608_v55, %v608_v55 }
 0x3a3   :  { %v611_v39 = vrot.slane %v609_v15, 7 }
 0x3a5   :  { %v613_v56 = vsub.f32 %v608_v55, %v611_v39 }
 0x3a7   :  { %v614_v0 = vadd.f32 1e-05, %v613_v56 }
 0x3a9   :  { %694 = vrsqrt.f32 %v614_v0  ;;  %vm621_vm7 = vweird.f32 %v614_v0 }
 0x3af   :  { %v695_v40 = vpop.eup %694 }
 0x3b0   :  { %v616_v2 = vmul.f32 %v695_v40, %v614_v0  ;;  %vm622_vm6 = vweird.f32 %v695_v40 }
 0x3b1   :  { %vm623_vm8 = vmor %vm621_vm7, %vm622_vm6 }
 0x3b2   :  { %v617_v63 = vmul.f32 %v695_v40, %v616_v2 }
 0x3b4   :  { %v618_v8 = vmul.f32 0.5, %v617_v63 }
 0x3b6   :  { %v619_v42 = vsub.f32 1.5, %v618_v8 }
 0x3b8   :  { %v620_v5 = vmul.f32 %v695_v40, %v619_v42 }
 0x3ba   :  { %v624_v44 = vsel %vm623_vm8, %v695_v40, %v620_v5 }
 0x3bb   :  { %626 = vst [vmem:[#allocation1] sm:$0xff] %v624_v44 }
 0x3c2   :  { %v628_v4 = vld [vmem:[#allocation1 + $0x1] ss:$9 sm:$0xff] }
 0x3c3   :  { %v630_v45 = vmul.f32 %v628_v4, %v563_v14 }
 0x3c5   :  { %v631_v49 = vmul.f32 %v630_v45, %v608_v55 }
 0x3c7   :  { %v632_v50 = vsub.f32 %v564_v47, %v631_v49 }
 0x3c9   :  { %v634_v53 = vperm.slane %v632_v50, 0 }
 0x3cb   :  { %v636_v19 = vsel %vm119_vm1, %v630_v45, %v634_v53 }
 0x3cc   :  { %687 = vmatmul.msk.f32.vlgmr.msrb.gmra.mxu3 %vm354_vm5, %v636_v19 }
 0x44f   :  { %v657_v1 = vpop.f32.mrf.mxu3 }
 0x450   :  { %v660_v12 = vperm.slane %v657_v1, 0  ;;  %v665_v6 = vperm.slane %v657_v1, 1 }
 0x452   :  { %v661_v7 = vmul.f32 %v660_v12, %v1309_v13  ;;  %v662_v29 = vmul.f32 %v660_v12, %v1307_v11  ;;  %v663_v9 = vmul.f32 %v660_v12, %v1311_v26  ;;  %v664_v10 = vmul.f32 %v660_v12, %v561_v32 }
 0x454   :  { %v666_v30 = vadd.f32 %v665_v6, %v661_v7  ;;  %v667_v21 = vadd.f32 %v665_v6, %v662_v29  ;;  %v668_v16 = vadd.f32 %v665_v6, %v663_v9  ;;  %v669_v17 = vadd.f32 %v665_v6, %v664_v10 }
 0x456   :  { %v670_v18 = vadd.f32 %v666_v30, %v928_v57  ;;  %v671_v20 = vadd.f32 %v667_v21, %v934_v58  ;;  %v672_v22 = vadd.f32 %v668_v16, %v942_v61  ;;  %v673_v31 = vadd.f32 %v669_v17, %v954_v3 }
 0x458   :  { %v674_v23 = vmax.f32 %v670_v18, 0.0  ;;  %v675_v24 = vmax.f32 %v671_v20, 0.0  ;;  %v676_v13 = vmax.f32 %v672_v22, 0.0  ;;  %v677_v25 = vmax.f32 %v673_v31, 0.0 }
 0x45a   :  { %678 = vst [vmem:[%s1361_s11] sm:$0xff] %v674_v23 }
 0x45b   :  { %679 = vst [vmem:[%s1361_s11 + $0x8] sm:$0xff] %v675_v24 }
 0x45c   :  { %680 = vst [vmem:[%s1361_s11 + $0x10] sm:$0xff] %v676_v13 }
 0x45d   :  { %681 = vst [vmem:[%s1361_s11 + $0x18] sm:$0xff] %v677_v25 }

</bundles_post_ra>
